<compile_context>
chip_gen: v7x
topology: tpu7x:2x2x1
jax: 0.10.0
libtpu: 0.0.40
codegen_flags: <defaults>
</compile_context>

<pallas_src>
import jax
import jax.numpy as jnp
import numpy as np
from jax.experimental import pallas as pl
from jax.experimental.pallas import tpu as pltpu


# ----------------------------------------------------------------------------
# Fused Pallas kernel: depth x (conv1d k=3 pad=1 + bias + ReLU)  ->  Linear(., 1)
# ----------------------------------------------------------------------------
def fused_cnn_kernel(*refs):
    """refs = (x, w0, b0, ..., w_{d-1}, b_{d-1}, wl, bl, out)

    x:   (B, L, Cin)      input activations, NLC
    w_d: (3*Cin_d, W_d)   im2col conv weight (row index = tap*Cin + c)
    b_d: (1, W_d)         conv bias
    wl:  (L, W_last)      fc weight, reordered to match the NLC element order
    bl:  (1, 1)           fc bias
    out: (B, 1)
    """
    x_ref = refs[0]
    wl_ref, bl_ref, out_ref = refs[-3], refs[-2], refs[-1]
    conv_refs = refs[1:-3]
    depth = len(conv_refs) // 2

    B, L, _ = x_ref.shape
    h = x_ref[...]                                             # (B, L, C) in VMEM/vregs

    for d in range(depth):
        w_ref = conv_refs[2 * d]                               # (3*C, W)
        b_ref = conv_refs[2 * d + 1]                           # (1, W)
        C = h.shape[2]
        W = w_ref.shape[1]
        # pad=1 handled in-kernel: zero rows at both ends of the length axis.
        zrow = jnp.zeros((B, 1, C), jnp.float32)
        hpad = jnp.concatenate([zrow, h, zrow], axis=1)        # (B, L+2, C)
        # im2col: taps k=0,1,2 (x[l-1], x[l], x[l+1]) side by side on the lane axis.
        x_col = jnp.concatenate(
            [hpad[:, 0:L, :], hpad[:, 1:L + 1, :], hpad[:, 2:L + 2, :]],
            axis=2)                                            # (B, L, 3C)
        # One MXU matmul per layer, batch folded into M = B*L.
        acc = jnp.dot(x_col.reshape(B * L, 3 * C), w_ref[...],
                      preferred_element_type=jnp.float32)      # (B*L, W)
        acc = acc + b_ref[...]                                 # bias broadcast
        h = jnp.maximum(acc, 0.0).reshape(B, L, W)             # ReLU, back to (B, L, W)

    # FC head: out[b] = sum_{l,w} h[b,l,w] * wl[l,w] + bias  (tiny, VPU+XLU)
    prod = h * wl_ref[...][None, :, :]                         # (B, L, W)
    s = jnp.sum(jnp.sum(prod, axis=2, keepdims=True), axis=1)  # (B, 1)
    out_ref[...] = s + bl_ref[...]


# ----------------------------------------------------------------------------
# One-time parameter preparation + forward wrapper (single pallas_call)
# ----------------------------------------------------------------------------
def prepare_params(conv_params, fc_w, fc_b, input_dim):
    """Hoisted out of the forward pass: conv weight (W, Cin, 3) -> im2col
    (3*Cin, W); fc weight (1, W*L) -> (L, W) reordered to the kernel's NLC
    flatten order (PyTorch flattens (B, W, L), index w*L + l)."""
    conv_cols = []
    for (w, b) in conv_params:
        Wout, Cin, K = w.shape
        w_col = jnp.transpose(w, (2, 1, 0)).reshape(K * Cin, Wout)   # (3*Cin, W)
        conv_cols.append((w_col, b.reshape(1, Wout)))
    W_last = conv_params[-1][0].shape[0]
    wl = fc_w[0].reshape(W_last, input_dim).T                        # (L, W)
    bl = fc_b.reshape(1, 1)
    return conv_cols, wl, bl


def cnn_forward(x_ncl, conv_cols, wl, bl):
    """Fused Pallas CNN forward. x_ncl: (B, C_in, L), matching PyTorch Conv1d."""
    x_nlc = jnp.transpose(x_ncl, (0, 2, 1))                    # NCL -> NLC, once
    B = x_nlc.shape[0]
    flat_params = [p for wb in conv_cols for p in wb]
    n_in = 1 + len(flat_params) + 2
    vmem = pltpu.MemorySpace.VMEM
    return pl.pallas_call(
        fused_cnn_kernel,
        out_shape=jax.ShapeDtypeStruct((B, 1), jnp.float32),
        in_specs=[pl.BlockSpec(memory_space=vmem) for _ in range(n_in)],
        out_specs=pl.BlockSpec(memory_space=vmem),
    )(x_nlc, *flat_params, wl, bl)


# ----------------------------------------------------------------------------
# Pure-JAX reference (mirrors the PyTorch module exactly, NCL layout)
# ----------------------------------------------------------------------------
def cnn_reference(x_ncl, conv_params, fc_w, fc_b):
    h = x_ncl
    for (w, b) in conv_params:
        B, Cin, L = h.shape
        hp = jnp.pad(h, ((0, 0), (0, 0), (1, 1)))
        out = sum(jnp.einsum('oc,bcl->bol', w[:, :, k], hp[:, :, k:k + L])
                  for k in range(3))
        out = out + b[None, :, None]
        h = jnp.maximum(out, 0.0)
    flat = h.reshape(h.shape[0], -1)
    return flat @ fc_w.T + fc_b


# ----------------------------------------------------------------------------
# Main
# ----------------------------------------------------------------------------
if __name__ == "__main__":
    # Small shapes consistent with CNN(input_dim, in_channels, depth, width)
    B, in_channels, input_dim, depth, width = 2, 4, 16, 2, 32

    key = jax.random.PRNGKey(0)
    keys = jax.random.split(key, 2 * (depth + 1) + 1)

    conv_params = []
    cin = in_channels
    for d in range(depth):
        kw = jax.random.normal(keys[2 * d], (width, cin, 3), jnp.float32) * 0.1
        kb = jax.random.normal(keys[2 * d + 1], (width,), jnp.float32) * 0.1
        conv_params.append((kw, kb))
        cin = width

    fc_w = jax.random.normal(keys[2 * depth], (1, width * input_dim), jnp.float32) * 0.05
    fc_b = jax.random.normal(keys[2 * depth + 1], (1,), jnp.float32) * 0.05

    x = jax.random.normal(keys[-1], (B, in_channels, input_dim), jnp.float32)

    # One-time weight preparation (im2col + fc reorder), then a single fused call.
    conv_cols, wl, bl = prepare_params(conv_params, fc_w, fc_b, input_dim)
    fwd = jax.jit(cnn_forward)
    out = jax.block_until_ready(fwd(x, conv_cols, wl, bl))

    ref = cnn_reference(x, conv_params, fc_w, fc_b)
    np.testing.assert_allclose(np.asarray(out), np.asarray(ref),
                               rtol=1e-4, atol=1e-4)
    assert out.shape == (B, 1)

    print("KERNEL_OK")
</pallas_src>

<mosaic_0001>
module attributes {stable_mosaic.version = 11 : i64} {
  func.func @fused_cnn_kernel(%arg0: memref<2x16x4xf32, #tpu.memory_space<vmem>>, %arg1: memref<12x32xf32, #tpu.memory_space<vmem>>, %arg2: memref<1x32xf32, #tpu.memory_space<vmem>>, %arg3: memref<96x32xf32, #tpu.memory_space<vmem>>, %arg4: memref<1x32xf32, #tpu.memory_space<vmem>>, %arg5: memref<16x32xf32, #tpu.memory_space<vmem>>, %arg6: memref<1x1xf32, #tpu.memory_space<vmem>>, %arg7: memref<2x1xf32, #tpu.memory_space<vmem>>) attributes {dimension_semantics = [], scalar_prefetch = 0 : i64, scratch_operands = 0 : i64, tpu.core_type = #tpu.core_type<tc>} {
    %c0 = arith.constant 0 : index
    %c0_0 = arith.constant 0 : index
    %c0_1 = arith.constant 0 : index
    %0 = vector.load %arg0[%c0, %c0_0, %c0_1] : memref<2x16x4xf32, #tpu.memory_space<vmem>>, vector<2x16x4xf32>
    %cst = arith.constant 0.000000e+00 : f32
    %1 = vector.broadcast %cst : f32 to vector<2x1x4xf32>
    %2 = tpu.concatenate %1, %0, %1 in 1 : vector<2x1x4xf32>, vector<2x16x4xf32>, vector<2x1x4xf32> -> vector<2x18x4xf32>
    %3 = vector.extract_strided_slice %2 {offsets = [0, 0, 0], sizes = [2, 16, 4], strides = [1, 1, 1]} : vector<2x18x4xf32> to vector<2x16x4xf32>
    %4 = vector.extract_strided_slice %2 {offsets = [0, 1, 0], sizes = [2, 16, 4], strides = [1, 1, 1]} : vector<2x18x4xf32> to vector<2x16x4xf32>
    %5 = vector.extract_strided_slice %2 {offsets = [0, 2, 0], sizes = [2, 16, 4], strides = [1, 1, 1]} : vector<2x18x4xf32> to vector<2x16x4xf32>
    %6 = tpu.concatenate %3, %4, %5 in 2 : vector<2x16x4xf32>, vector<2x16x4xf32>, vector<2x16x4xf32> -> vector<2x16x12xf32>
    %7 = vector.shape_cast %6 : vector<2x16x12xf32> to vector<32x12xf32>
    %c0_2 = arith.constant 0 : index
    %c0_3 = arith.constant 0 : index
    %8 = vector.load %arg1[%c0_2, %c0_3] : memref<12x32xf32, #tpu.memory_space<vmem>>, vector<12x32xf32>
    %cst_4 = arith.constant dense<0.000000e+00> : vector<32x32xf32>
    %9 = tpu.matmul %7, %8, %cst_4 {dimension_numbers = #tpu.dot_dimension_numbers<[1], [0], [0], [1], [0, 0, 1, 1], [], []>} : vector<32x12xf32>, vector<12x32xf32>, vector<32x32xf32> -> vector<32x32xf32>
    %c0_5 = arith.constant 0 : index
    %c0_6 = arith.constant 0 : index
    %10 = vector.load %arg2[%c0_5, %c0_6] : memref<1x32xf32, #tpu.memory_space<vmem>>, vector<1x32xf32>
    %11 = vector.broadcast %10 : vector<1x32xf32> to vector<32x32xf32>
    %12 = arith.addf %9, %11 : vector<32x32xf32>
    %cst_7 = arith.constant 0.000000e+00 : f32
    %13 = vector.broadcast %cst_7 : f32 to vector<32x32xf32>
    %14 = arith.maximumf %12, %13 : vector<32x32xf32>
    %15 = vector.shape_cast %14 : vector<32x32xf32> to vector<2x16x32xf32>
    %cst_8 = arith.constant 0.000000e+00 : f32
    %16 = vector.broadcast %cst_8 : f32 to vector<2x1x32xf32>
    %17 = tpu.concatenate %16, %15, %16 in 1 : vector<2x1x32xf32>, vector<2x16x32xf32>, vector<2x1x32xf32> -> vector<2x18x32xf32>
    %18 = vector.extract_strided_slice %17 {offsets = [0, 0, 0], sizes = [2, 16, 32], strides = [1, 1, 1]} : vector<2x18x32xf32> to vector<2x16x32xf32>
    %19 = vector.extract_strided_slice %17 {offsets = [0, 1, 0], sizes = [2, 16, 32], strides = [1, 1, 1]} : vector<2x18x32xf32> to vector<2x16x32xf32>
    %20 = vector.extract_strided_slice %17 {offsets = [0, 2, 0], sizes = [2, 16, 32], strides = [1, 1, 1]} : vector<2x18x32xf32> to vector<2x16x32xf32>
    %21 = tpu.concatenate %18, %19, %20 in 2 : vector<2x16x32xf32>, vector<2x16x32xf32>, vector<2x16x32xf32> -> vector<2x16x96xf32>
    %22 = vector.shape_cast %21 : vector<2x16x96xf32> to vector<32x96xf32>
    %c0_9 = arith.constant 0 : index
    %c0_10 = arith.constant 0 : index
    %23 = vector.load %arg3[%c0_9, %c0_10] : memref<96x32xf32, #tpu.memory_space<vmem>>, vector<96x32xf32>
    %cst_11 = arith.constant dense<0.000000e+00> : vector<32x32xf32>
    %24 = tpu.matmul %22, %23, %cst_11 {dimension_numbers = #tpu.dot_dimension_numbers<[1], [0], [0], [1], [0, 0, 1, 1], [], []>} : vector<32x96xf32>, vector<96x32xf32>, vector<32x32xf32> -> vector<32x32xf32>
    %c0_12 = arith.constant 0 : index
    %c0_13 = arith.constant 0 : index
    %25 = vector.load %arg4[%c0_12, %c0_13] : memref<1x32xf32, #tpu.memory_space<vmem>>, vector<1x32xf32>
    %26 = vector.broadcast %25 : vector<1x32xf32> to vector<32x32xf32>
    %27 = arith.addf %24, %26 : vector<32x32xf32>
    %cst_14 = arith.constant 0.000000e+00 : f32
    %28 = vector.broadcast %cst_14 : f32 to vector<32x32xf32>
    %29 = arith.maximumf %27, %28 : vector<32x32xf32>
    %30 = vector.shape_cast %29 : vector<32x32xf32> to vector<2x16x32xf32>
    %c0_15 = arith.constant 0 : index
    %c0_16 = arith.constant 0 : index
    %31 = vector.load %arg5[%c0_15, %c0_16] : memref<16x32xf32, #tpu.memory_space<vmem>>, vector<16x32xf32>
    %32 = vector.shape_cast %31 : vector<16x32xf32> to vector<1x16x32xf32>
    %33 = vector.broadcast %32 : vector<1x16x32xf32> to vector<2x16x32xf32>
    %34 = arith.mulf %30, %33 : vector<2x16x32xf32>
    %cst_17 = arith.constant dense<0.000000e+00> : vector<2x16xf32>
    %35 = vector.multi_reduction <add>, %34, %cst_17 [2] : vector<2x16x32xf32> to vector<2x16xf32>
    %36 = vector.shape_cast %35 : vector<2x16xf32> to vector<2x16x1xf32>
    %cst_18 = arith.constant dense<0.000000e+00> : vector<2x1xf32>
    %37 = vector.multi_reduction <add>, %36, %cst_18 [1] : vector<2x16x1xf32> to vector<2x1xf32>
    %c0_19 = arith.constant 0 : index
    %c0_20 = arith.constant 0 : index
    %38 = vector.load %arg6[%c0_19, %c0_20] : memref<1x1xf32, #tpu.memory_space<vmem>>, vector<1x1xf32>
    %39 = vector.broadcast %38 : vector<1x1xf32> to vector<2x1xf32>
    %40 = arith.addf %37, %39 : vector<2x1xf32>
    %c0_21 = arith.constant 0 : index
    %c0_22 = arith.constant 0 : index
    %41 = vector.load %arg7[%c0_21, %c0_22] : memref<2x1xf32, #tpu.memory_space<vmem>>, vector<2x1xf32>
    tpu.vector_store %arg7[%c0_21, %c0_22], %40 {strides = array<i32>} : memref<2x1xf32, #tpu.memory_space<vmem>>, vector<2x1xf32>,
    return
  }
}

</mosaic_0001>

<bundles_post_ra>
// kernel: cnn_forward.1
= control target key start
LH: loop header
LB: loop body
LE: loop exit
PB: predicated region body
PF: predicated region fallthrough
CT: control target
= control target key end

     0   :  { %vm36_vm0 = vcmask 1040384   ;;  %vm80_vm1 = vcmask 1045504   ;;  %vm57_vm2 = vcmask 1046528   ;;  %vm135_vm3 = vcmask 1043456   ;;  %s589_s12 = smov 8   ;;  %s590_s13 = smov 4   ;;  %s763_s0 = inlined_call_operand.vmem [shape: f32[2,16,4], index: 0, kind: input, shape index: {}]   ;;  %s764_s1 = inlined_call_operand.vmem [shape: f32[12,32], index: 1, kind: input, shape index: {}]   ;;  %s765_s3 = inlined_call_operand.vmem [shape: f32[96,32], index: 3, kind: input, shape index: {}]   ;;  %s766_s2 = inlined_call_operand.vmem [shape: f32[1,32], index: 2, kind: input, shape index: {}]   ;;  %s767_s4 = inlined_call_operand.vmem [shape: f32[1,32], index: 4, kind: input, shape index: {}]   ;;  %s768_s5 = inlined_call_operand.vmem [shape: f32[16,32], index: 5, kind: input, shape index: {}]   ;;  %s769_s6 = inlined_call_operand.<no memory space> [shape: f32[1,1], index: 6, kind: input, shape index: {}]   ;;  %s770_s7 = inlined_call_operand.vmem [shape: f32[2,1], index: 7, kind: output, shape index: {}]  }
   0x1   :  { %v28_v0 = vld [vmem:[%s763_s0] sm:$0xff]  ;;  %v29_v1 = vld [vmem:[%s763_s0 + $0x8] sm:$0xff]  ;;  %v30_v2 = vld [vmem:[%s763_s0 + $0x10] sm:$0xff]  ;;  %vm591_vm4 = vmmov 1   ;;  %vm103_vm6 = vcmask 31744   ;;  %vm108_vm7 = vcmask 64512  }
   0x2   :  { %v37_v3 = vrot.slane %v28_v0, 7  ;;  %v38_v4 = vrot.slane %v29_v1, 7  ;;  %v31_v5 = vld [vmem:[%s763_s0 + $0x18] sm:$0xff]  ;;  %v40_v6 = vrot.slane %v30_v2, 7  ;;  %v113_v20 = vld [vmem:[%s764_s1] sm:$0xff]  ;;  %vm555_vm5 = vmpackc.low %vm135_vm3, %vm591_vm4  ;;  %vm122_vm8 = vcmask 97280  }
   0x3   :  { %v41_v7 = vrot.slane %v31_v5, 7  ;;  %v114_v21 = vld [vmem:[%s764_s1 + $0x8] sm:$0xf]  ;;  %v306_v53 = vld [vmem:[%s765_s3] sm:$0xff]  ;;  %v308_v55 = vld [vmem:[%s765_s3 + $0x10] sm:$0xff]  ;;  %vm296_vm9 = vcmask 261120  }
   0x4   :  { %v39_v8 = vsel %vm36_vm0, %v37_v3, %v38_v4  ;;  %v49_v9 = vsel %vm36_vm0, 0.0, %v37_v3  ;;  %v51_v10 = vsel %vm36_vm0, %v38_v4, 0.0  ;;  %v50_v11 = vsel %vm36_vm0, 0.0, %v40_v6  ;;  %v307_v54 = vld [vmem:[%s765_s3 + $0x8] sm:$0xff]  ;;  %v309_v57 = vld [vmem:[%s765_s3 + $0x18] sm:$0xff]  ;;  %v310_v59 = vld [vmem:[%s765_s3 + $0x20] sm:$0xff] }
   0x5   :  { %v81_v12 = vrot.slane %v49_v9, 2  ;;  %v82_v13 = vrot.slane %v39_v8, 2  ;;  %v58_v14 = vrot.slane %v49_v9, 1  ;;  %v59_v15 = vrot.slane %v39_v8, 1  ;;  %v311_v60 = vld [vmem:[%s765_s3 + $0x28] sm:$0xff]  ;;  %v312_v62 = vld [vmem:[%s765_s3 + $0x30] sm:$0xff] }
   0x6   :  { %v84_v16 = vrot.slane %v51_v10, 2  ;;  %v61_v17 = vrot.slane %v51_v10, 1  ;;  %v42_v18 = vsel %vm36_vm0, %v40_v6, %v41_v7  ;;  %v52_v19 = vsel %vm36_vm0, %v41_v7, 0.0  ;;  %v313_v63 = vld [vmem:[%s765_s3 + $0x38] sm:$0xff]  ;;  %v314_v1 = vld [vmem:[%s765_s3 + $0x40] sm:$0xff]  ;;  %v315_v2 = vld [vmem:[%s765_s3 + $0x48] sm:$0xff] }
   0x7   :  { %v83_v22 = vsel %vm80_vm1, %v81_v12, %v82_v13  ;;  %v60_v23 = vsel %vm57_vm2, %v58_v14, %v59_v15  ;;  %v64_v24 = vrot.slane %v42_v18, 1  ;;  %v66_v25 = vrot.slane %v52_v19, 1  ;;  %v480_v4 = vld [vmem:[%s766_s2] ss:$0 sm:$0xff]  ;;  %v316_v5 = vld [vmem:[%s765_s3 + $0x50] sm:$0xff]  ;;  %v317_v6 = vld [vmem:[%s765_s3 + $0x58] sm:$0xff] }
   0x8   :  { %91 = vrot.lane.b32.xlu1 %v83_v22, %s589_s12  ;;  %68 = vrot.lane.b32.xlu0 %v60_v23, %s590_s13  ;;  %v85_v26 = vsel %vm80_vm1, %v82_v13, %v84_v16  ;;  %v62_v27 = vsel %vm57_vm2, %v59_v15, %v61_v17  ;;  %v63_v28 = vrot.slane %v50_v11, 1  ;;  %v554_v29 = vpack.c.bf16 %v114_v21, %v113_v20  ;;  %s592_s2 = smov 32   ;;  %s593_s3 = smov 64  }
   0x9   :  { %v87_v30 = vrot.slane %v42_v18, 2  ;;  %v67_v31 = vsel %vm57_vm2, %v64_v24, %v66_v25  ;;  %v89_v33 = vrot.slane %v52_v19, 2  ;;  %v86_v34 = vrot.slane %v50_v11, 2 }
   0xa   :  { %556 = vmatprep.subr.msk.bf16.mxu0 %vm555_vm5, %v554_v29  ;;  %v65_v32 = vsel %vm57_vm2, %v63_v28, %v64_v24  ;;  %v560_v56 = vpack.c.bf16 %v307_v54, %v306_v53  ;;  %v564_v58 = vpack.c.bf16 %v309_v57, %v308_v55  ;;  %v568_v61 = vpack.c.bf16 %v311_v60, %v310_v59 }
   0xb   :  { %559 = vmatpush3.bf16.msk.msra.mxu0 %vm555_vm5, %v554_v29  ;;  %v90_v35 = vsel %vm80_vm1, %v87_v30, %v89_v33  ;;  %v88_v36 = vsel %vm80_vm1, %v86_v34, %v87_v30  ;;  %v572_v0 = vpack.c.bf16 %v313_v63, %v312_v62  ;;  %v576_v3 = vpack.c.bf16 %v315_v2, %v314_v1  ;;  %v486_v2 = vld [vmem:[%s767_s4] ss:$0 sm:$0xff] }
   0xc   :  { %93 = vrot.lane.b32.xlu1 %v85_v26, %s589_s12  ;;  %70 = vrot.lane.b32.xlu0 %v62_v27, %s590_s13  ;;  %vm301_vm10 = vcmask 523264   ;;  %vm325_vm11 = vcmask 785408   ;;  %vm471_vm12 = vcmask 1041409   ;;  %vm474_vm13 = vcmask 1024  }
   0xd   :  { %561 = vmatprep.subr.bf16.mxu1 %v560_v56 }
   0xe   :  { %563 = vmatpush3.bf16.msra.mxu1 %v560_v56 }
   0xf   :  { %565 = vmatprep.subr.bf16.mxu1 %v564_v58 }
  0x10   :  { %74 = vrot.lane.b32.xlu1 %v67_v31, %s590_s13  ;;  %72 = vrot.lane.b32.xlu0 %v65_v32, %s590_s13 }
  0x12   :  { %567 = vmatpush3.bf16.msra.mxu1 %v564_v58 }
  0x13   :  { %569 = vmatprep.subr.bf16.mxu1 %v568_v61 }
  0x14   :  { %97 = vrot.lane.b32.xlu1 %v90_v35, %s589_s12  ;;  %95 = vrot.lane.b32.xlu0 %v88_v36, %s589_s12 }
  0x16   :  { %571 = vmatpush3.bf16.msra.mxu1 %v568_v61 }
  0x17   :  { %573 = vmatprep.subr.bf16.mxu1 %v572_v0 }
  0x1a   :  { %575 = vmatpush3.bf16.msra.mxu1 %v572_v0 }
  0x1b   :  { %577 = vmatprep.subr.bf16.mxu1 %v576_v3 }
  0x1e   :  { %579 = vmatpush3.bf16.msra.mxu1 %v576_v3 }
  0x7a   :  { %v92_v37 = vpop.permute.xlu1 %91  ;;  %v69_v38 = vpop.permute.xlu0 %68 }
  0x7b   :  { %v104_v39 = vsel %vm103_vm6, %v49_v9, %v69_v38 }
  0x7c   :  { %v109_v40 = vsel %vm108_vm7, %v104_v39, %v92_v37 }
  0x7d   :  { %518 = vmatprep.mubr.msk.f32.mxu0 %vm122_vm8, %v109_v40 }
  0x7e   :  { %v94_v41 = vpop.permute.xlu1 %93  ;;  %v71_v42 = vpop.permute.xlu0 %70 }
  0x7f   :  { %v105_v43 = vsel %vm103_vm6, %v39_v8, %v71_v42  ;;  %v580_v8 = vpack.c.bf16 %v317_v6, %v316_v5  ;;  %v427_v6 = vld [vmem:[%s768_s5] sm:$0xff] }
  0x80   :  { %v110_v44 = vsel %vm108_vm7, %v105_v43, %v94_v41 }
  0x81   :  { %519 = vmatmul.mubr.msk.f32.vlgmr.msra.gmra.mrb[0].mxu0 %vm122_vm8, %v110_v44  ;;  %581 = vmatprep.subr.bf16.mxu1 %v580_v8 }
  0x82   :  { %v75_v45 = vpop.permute.xlu1 %74  ;;  %v73_v46 = vpop.permute.xlu0 %72  ;;  %583 = vmatpush3.bf16.msra.mxu1 %v580_v8 }
  0x83   :  { %v107_v47 = vsel %vm103_vm6, %v42_v18, %v75_v45  ;;  %v106_v48 = vsel %vm103_vm6, %v50_v11, %v73_v46 }
  0x86   :  { %v98_v49 = vpop.permute.xlu1 %97  ;;  %v96_v50 = vpop.permute.xlu0 %95 }
  0x87   :  { %v112_v51 = vsel %vm108_vm7, %v107_v47, %v98_v49  ;;  %v111_v52 = vsel %vm108_vm7, %v106_v48, %v96_v50 }
  0x88   :  { %521 = vmatprep.mubr.msk.f32.mxu0 %vm122_vm8, %v111_v52 }
  0x89   :  { %522 = vmatmul.mubr.msk.f32.gmra.mrb[2].mxu0 %vm122_vm8, %v112_v51 }
 0x154   :  { %v520_v7 = vpop.f32.mrb[0].mxu0 }
 0x155   :  { %v211_v9 = vadd.f32 %v520_v7, %v480_v4  ;;  %v205_v10 = vpop.f32.mrb[1].mxu0 }
 0x156   :  { %v206_v11 = vadd.f32 %v480_v4, %v205_v10 }
 0x157   :  { %v225_v12 = vmax.f32 %v211_v9, 0.0 }
 0x158   :  { %v224_v13 = vmax.f32 %v206_v11, 0.0 }
 0x159   :  { %v233_v14 = vrot.slane %v225_v12, 7 }
 0x15a   :  { %v232_v15 = vrot.slane %v224_v13, 7 }
 0x15b   :  { %v246_v16 = vsel %vm36_vm0, %v233_v14, 0.0 }
 0x15c   :  { %v255_v17 = vrot.slane %v246_v16, 1  ;;  %v234_v18 = vsel %vm36_vm0, %v232_v15, %v233_v14  ;;  %v244_v19 = vsel %vm36_vm0, 0.0, %v232_v15  ;;  %v523_v20 = vpop.f32.mrb[2].mxu0  ;;  %v277_v25 = vrot.slane %v246_v16, 2 }
 0x15d   :  { %v252_v21 = vrot.slane %v244_v19, 1  ;;  %v221_v22 = vadd.f32 %v523_v20, %v480_v4  ;;  %v215_v23 = vpop.f32.mrb[3].mxu0  ;;  %v253_v24 = vrot.slane %v234_v18, 1  ;;  %v274_v26 = vrot.slane %v244_v19, 2 }
 0x15e   :  { %v216_v27 = vadd.f32 %v480_v4, %v215_v23  ;;  %v275_v31 = vrot.slane %v234_v18, 2 }
 0x15f   :  { %v227_v28 = vmax.f32 %v221_v22, 0.0  ;;  %v256_v29 = vsel %vm57_vm2, %v253_v24, %v255_v17  ;;  %v254_v30 = vsel %vm57_vm2, %v252_v21, %v253_v24 }
 0x160   :  { %v226_v32 = vmax.f32 %v216_v27, 0.0  ;;  %264 = vrot.lane.b32.xlu1 %v256_v29, %s592_s2  ;;  %262 = vrot.lane.b32.xlu0 %v254_v30, %s592_s2  ;;  %v278_v36 = vsel %vm80_vm1, %v275_v31, %v277_v25  ;;  %v276_v37 = vsel %vm80_vm1, %v274_v26, %v275_v31  ;;  %v12_v25 = vstv %s769_s6 }
 0x161   :  { %v236_v33 = vrot.slane %v227_v28, 7  ;;  %13 = vst [vmem:[#allocation2] sm:$0x1] %v12_v25 }
 0x162   :  { %v235_v34 = vrot.slane %v226_v32, 7 }
 0x163   :  { %v247_v35 = vsel %vm36_vm0, %v236_v33, 0.0 }
 0x164   :  { %v260_v38 = vrot.slane %v247_v35, 1  ;;  %v237_v39 = vsel %vm36_vm0, %v235_v34, %v236_v33  ;;  %v245_v40 = vsel %vm36_vm0, 0.0, %v235_v34  ;;  %286 = vrot.lane.b32.xlu1 %v278_v36, %s593_s3  ;;  %284 = vrot.lane.b32.xlu0 %v276_v37, %s593_s3  ;;  %v282_v43 = vrot.slane %v247_v35, 2 }
 0x165   :  { %v257_v41 = vrot.slane %v245_v40, 1  ;;  %v258_v42 = vrot.slane %v237_v39, 1  ;;  %v279_v44 = vrot.slane %v245_v40, 2  ;;  %v280_v47 = vrot.slane %v237_v39, 2 }
 0x167   :  { %v261_v45 = vsel %vm57_vm2, %v258_v42, %v260_v38  ;;  %v259_v46 = vsel %vm57_vm2, %v257_v41, %v258_v42  ;;  %v283_v48 = vsel %vm80_vm1, %v280_v47, %v282_v43  ;;  %v281_v49 = vsel %vm80_vm1, %v279_v44, %v280_v47 }
 0x168   :  { %268 = vrot.lane.b32.xlu1 %v261_v45, %s592_s2  ;;  %266 = vrot.lane.b32.xlu0 %v259_v46, %s592_s2 }
 0x16c   :  { %290 = vrot.lane.b32.xlu1 %v283_v48, %s593_s3  ;;  %288 = vrot.lane.b32.xlu0 %v281_v49, %s593_s3 }
 0x1d2   :  { %v265_v50 = vpop.permute.xlu1 %264  ;;  %v263_v51 = vpop.permute.xlu0 %262 }
 0x1d3   :  { %v298_v52 = vsel %vm296_vm9, %v234_v18, %v265_v50  ;;  %v297_v53 = vsel %vm296_vm9, %v244_v19, %v263_v51  ;;  %v428_v18 = vld [vmem:[%s768_s5 + $0x8] sm:$0xff] }
 0x1d6   :  { %v287_v54 = vpop.permute.xlu1 %286  ;;  %v285_v55 = vpop.permute.xlu0 %284 }
 0x1d7   :  { %v303_v56 = vsel %vm301_vm10, %v298_v52, %v287_v54  ;;  %v302_v57 = vsel %vm301_vm10, %v297_v53, %v285_v55 }
 0x1d8   :  { %548 = vmatprep.mubr.msk.f32.mxu1 %vm325_vm11, %v302_v57 }
 0x1d9   :  { %549 = vmatmul.mubr.msk.f32.vlgmr.msra.gmra.mrb[0].mxu1 %vm325_vm11, %v303_v56 }
 0x1da   :  { %v269_v58 = vpop.permute.xlu1 %268  ;;  %v267_v59 = vpop.permute.xlu0 %266 }
 0x1db   :  { %v300_v60 = vsel %vm296_vm9, %v237_v39, %v269_v58  ;;  %v299_v61 = vsel %vm296_vm9, %v245_v40, %v267_v59  ;;  %v491_v40 = vld [vmem:[#allocation2] ss:$0 sm:$0xff] }
 0x1de   :  { %v291_v62 = vpop.permute.xlu1 %290  ;;  %v289_v63 = vpop.permute.xlu0 %288 }
 0x1df   :  { %v305_v0 = vsel %vm301_vm10, %v300_v60, %v291_v62  ;;  %v304_v1 = vsel %vm301_vm10, %v299_v61, %v289_v63 }
 0x1e0   :  { %551 = vmatprep.mubr.msk.f32.mxu1 %vm325_vm11, %v304_v1 }
 0x1e1   :  { %552 = vmatmul.mubr.msk.f32.gmra.mrb[2].mxu1 %vm325_vm11, %v305_v0 }
 0x2ac   :  { %v550_v3 = vpop.f32.mrb[0].mxu1 }
 0x2ad   :  { %v404_v4 = vpop.f32.mrb[1].mxu1  ;;  %v410_v9 = vadd.f32 %v550_v3, %v486_v2 }
 0x2ae   :  { %v405_v5 = vadd.f32 %v486_v2, %v404_v4 }
 0x2af   :  { %v424_v16 = vmax.f32 %v410_v9, 0.0 }
 0x2b0   :  { %v423_v7 = vmax.f32 %v405_v5, 0.0 }
 0x2b1   :  { %v430_v23 = vmul.f32 %v428_v18, %v424_v16 }
 0x2b2   :  { %v429_v8 = vmul.f32 %v427_v6, %v423_v7 }
 0x2b3   :  { %v436_v24 = vsel %vm296_vm9, %v430_v23, 0.0 }
 0x2b4   :  { %v553_v10 = vpop.f32.mrb[2].mxu1  ;;  %v433_v11 = vsel %vm296_vm9, %v429_v8, 0.0 }
 0x2b5   :  { %v420_v12 = vadd.f32 %v553_v10, %v486_v2  ;;  %434 = vadd.xlane.f32.xlu0 %v433_v11  ;;  %v414_v13 = vpop.f32.mrb[3].mxu1 }
 0x2b6   :  { %v415_v14 = vadd.f32 %v486_v2, %v414_v13 }
 0x2b7   :  { %v426_v15 = vmax.f32 %v420_v12, 0.0 }
 0x2b8   :  { %v425_v17 = vmax.f32 %v415_v14, 0.0 }
 0x2b9   :  { %v432_v19 = vmul.f32 %v428_v18, %v426_v15 }
 0x2ba   :  { %v431_v20 = vmul.f32 %v427_v6, %v425_v17 }
 0x2bb   :  { %v442_v21 = vsel %vm296_vm9, %v432_v19, 0.0 }
 0x2bc   :  { %443 = vadd.xlane.f32.xlu1 %v442_v21  ;;  %v439_v22 = vsel %vm296_vm9, %v431_v20, 0.0 }
 0x2bd   :  { %440 = vadd.xlane.f32.xlu0 %v439_v22 }
 0x2c1   :  { %437 = vadd.xlane.f32.xlu0 %v436_v24 }
 0x342   :  { %v435_v26 = vpop.xlane.xlu0 %434 }
 0x349   :  { %v444_v27 = vpop.xlane.xlu1 %443 }
 0x34a   :  { %v441_v28 = vpop.xlane.xlu0 %440 }
 0x34b   :  { %v452_v29 = vadd.f32 %v444_v27, %v441_v28 }
 0x34d   :  { %v453_v30 = vrot.slane %v452_v29, 4 }
 0x34e   :  { %v438_v31 = vpop.xlane.xlu0 %437 }
 0x34f   :  { %v454_v32 = vadd.f32 %v453_v30, %v452_v29  ;;  %v445_v33 = vadd.f32 %v438_v31, %v435_v26 }
 0x351   :  { %v455_v34 = vrot.slane %v454_v32, 2  ;;  %v446_v35 = vrot.slane %v445_v33, 4 }
 0x353   :  { %v456_v36 = vadd.f32 %v455_v34, %v454_v32  ;;  %v447_v37 = vadd.f32 %v446_v35, %v445_v33 }
 0x355   :  { %v457_v38 = vrot.slane %v456_v36, 1  ;;  %v448_v39 = vrot.slane %v447_v37, 2 }
 0x357   :  { %v458_v41 = vadd.f32 %v457_v38, %v456_v36  ;;  %v449_v42 = vadd.f32 %v448_v39, %v447_v37 }
 0x359   :  { %v467_v43 = vadd.f32 %v491_v40, %v458_v41  ;;  %v450_v44 = vrot.slane %v449_v42, 1 }
 0x35b   :  { %v451_v45 = vadd.f32 %v450_v44, %v449_v42  ;;  %v470_v46 = vrot.slane %v467_v43, 7 }
 0x35d   :  { %v466_v47 = vadd.f32 %v491_v40, %v451_v45 }
 0x35f   :  { %v472_v48 = vsel %vm471_vm12, %v470_v46, %v466_v47 }
 0x360   :  { %475 = vst.msk [vmem:[%s770_s7] sm:$0x3] %vm474_vm13, %v472_v48 }

</bundles_post_ra>
